<compile_context>
chip_gen: v7x
topology: tpu7x:2x2x1
jax: 0.10.0
libtpu: 0.0.40
codegen_flags: <defaults>
</compile_context>

<pallas_src>
from functools import partial

import jax
import jax.numpy as jnp
from jax.experimental import pallas as pl
from jax.experimental.pallas import tpu as pltpu


def _lstm_fc_kernel(x2d_ref, wih_ref, whh_ref, b_ref, fcw_ref, fcb_ref,
                    out_ref, *, seq_len, batch):
    H = whh_ref.shape[0]

    # Input projection + fused bias for ALL timesteps in one MXU matmul.
    # Stays in vregs (no VMEM scratch round trip); gate order is [i, f, o, g].
    gpre = (jnp.dot(x2d_ref[...], wih_ref[...],
                    preferred_element_type=jnp.float32)
            + b_ref[...])                                    # (T*B, 4H)

    # Loop-invariant recurrent weight, hoisted (lives in vregs).
    w_hh = whh_ref[...]                                      # (H, 4H)

    h = jnp.zeros((batch, H), jnp.float32)
    c = jnp.zeros((batch, H), jnp.float32)

    # Fully unrolled recurrence with static slices (T is tiny and static).
    for t in range(seq_len):
        gates = (gpre[t * batch:(t + 1) * batch, :]
                 + jnp.dot(h, w_hh, preferred_element_type=jnp.float32))
        # One sigmoid over contiguous [0, 3H) lanes (i, f, o), one tanh over
        # [3H, 4H) (g) -- gate columns were permuted in the wrapper.
        ifo = jax.nn.sigmoid(gates[:, 0:3 * H])
        i_g = ifo[:, 0:H]
        f_g = ifo[:, H:2 * H]
        o_g = ifo[:, 2 * H:3 * H]
        g_g = jnp.tanh(gates[:, 3 * H:4 * H])
        c = f_g * c + i_g * g_g
        h = o_g * jnp.tanh(c)

    # Final Linear on the last hidden state; lane-padded output (sliced back
    # to num_classes in the wrapper).
    out_ref[...] = (jnp.dot(h, fcw_ref[...],
                            preferred_element_type=jnp.float32)
                    + fcb_ref[...]).astype(out_ref.dtype)


def _permute_gates_ifog_to_ifog_last(a):
    """Reorder the 4H axis (axis 0) from PyTorch [i, f, g, o] to [i, f, o, g]."""
    i, f, g, o = jnp.split(a, 4, axis=0)
    return jnp.concatenate([i, f, o, g], axis=0)


def prepare_params(w_ih, w_hh, b_ih, b_hh, fc_w, fc_b):
    """One-time (init) parameter transforms; do NOT run these per forward call.

    w_ih: (4H, I), w_hh: (4H, H), b_ih/b_hh: (4H,), fc_w: (C, H), fc_b: (C,).
    """
    H = w_hh.shape[1]
    C = fc_w.shape[0]
    LANE = 128
    C_pad = ((C + LANE - 1) // LANE) * LANE                  # lane-dense FC out

    wih_t = jnp.transpose(
        _permute_gates_ifog_to_ifog_last(w_ih.astype(jnp.float32)))  # (I, 4H)
    whh_t = jnp.transpose(
        _permute_gates_ifog_to_ifog_last(w_hh.astype(jnp.float32)))  # (H, 4H)
    bias = _permute_gates_ifog_to_ifog_last(
        (b_ih + b_hh).astype(jnp.float32).reshape(4 * H, 1)
    ).reshape(1, 4 * H)

    fcw_t = jnp.zeros((H, C_pad), jnp.float32)
    fcw_t = fcw_t.at[:, :C].set(jnp.transpose(fc_w).astype(jnp.float32))
    fcb = jnp.zeros((1, C_pad), jnp.float32)
    fcb = fcb.at[:, :C].set(fc_b.astype(jnp.float32).reshape(1, C))

    return (wih_t, whh_t, bias, fcw_t, fcb)


@partial(jax.jit, static_argnames=("num_classes",))
def emotion_rnn_forward(x, wih_t, whh_t, bias, fcw_t, fcb, *, num_classes):
    """x: (B, T, I) float32, PyTorch batch_first layout. Returns (B, num_classes)."""
    B, T, I = x.shape
    H = whh_t.shape[0]
    C_pad = fcw_t.shape[1]

    # Time-major, flattened to (T*B, I); fuses with the rest under this jit.
    x2d = jnp.transpose(x, (1, 0, 2)).reshape(T * B, I).astype(jnp.float32)

    grid_spec = pltpu.PrefetchScalarGridSpec(
        num_scalar_prefetch=0,
        grid=(1,),                                           # single invocation
        in_specs=[
            pl.BlockSpec((T * B, I), lambda i: (0, 0)),      # flattened x
            pl.BlockSpec((I, 4 * H), lambda i: (0, 0)),      # W_ih^T (permuted)
            pl.BlockSpec((H, 4 * H), lambda i: (0, 0)),      # W_hh^T (permuted)
            pl.BlockSpec((1, 4 * H), lambda i: (0, 0)),      # fused bias
            pl.BlockSpec((H, C_pad), lambda i: (0, 0)),      # fc W^T (padded)
            pl.BlockSpec((1, C_pad), lambda i: (0, 0)),      # fc bias (padded)
        ],
        out_specs=pl.BlockSpec((B, C_pad), lambda i: (0, 0)),
    )

    out_pad = pl.pallas_call(
        partial(_lstm_fc_kernel, seq_len=T, batch=B),
        out_shape=jax.ShapeDtypeStruct((B, C_pad), jnp.float32),
        grid_spec=grid_spec,
        compiler_params=pltpu.CompilerParams(
            dimension_semantics=("arbitrary",)),
    )(x2d, wih_t, whh_t, bias, fcw_t, fcb)

    return out_pad[:, :num_classes]


def _reference_forward(x, w_ih, w_hh, b_ih, b_hh, fc_w, fc_b):
    """Pure-JAX reference mirroring PyTorch nn.LSTM (+ nn.Linear) semantics."""
    B, T, I = x.shape
    H = w_hh.shape[1]
    h = jnp.zeros((B, H), jnp.float32)
    c = jnp.zeros((B, H), jnp.float32)

    def step(carry, x_t):
        h, c = carry
        gates = x_t @ w_ih.T + h @ w_hh.T + b_ih + b_hh
        i = jax.nn.sigmoid(gates[:, 0 * H:1 * H])
        f = jax.nn.sigmoid(gates[:, 1 * H:2 * H])
        g = jnp.tanh(gates[:, 2 * H:3 * H])
        o = jax.nn.sigmoid(gates[:, 3 * H:4 * H])
        c = f * c + i * g
        h = o * jnp.tanh(c)
        return (h, c), h

    (h, c), _ = jax.lax.scan(step, (h, c), jnp.transpose(x, (1, 0, 2)))
    return h @ fc_w.T + fc_b


if __name__ == "__main__":
    # Small shapes consistent with the module's forward: x is (B, T, input_size).
    B, T, I, H, C = 8, 8, 16, 32, 3

    key = jax.random.PRNGKey(0)
    ks = jax.random.split(key, 7)
    bound = 1.0 / jnp.sqrt(H)

    x = jax.random.normal(ks[0], (B, T, I), dtype=jnp.float32)
    w_ih = jax.random.uniform(ks[1], (4 * H, I), jnp.float32, -bound, bound)
    w_hh = jax.random.uniform(ks[2], (4 * H, H), jnp.float32, -bound, bound)
    b_ih = jax.random.uniform(ks[3], (4 * H,), jnp.float32, -bound, bound)
    b_hh = jax.random.uniform(ks[4], (4 * H,), jnp.float32, -bound, bound)
    fc_w = jax.random.uniform(ks[5], (C, H), jnp.float32, -bound, bound)
    fc_b = jax.random.uniform(ks[6], (C,), jnp.float32, -bound, bound)

    # One-time parameter prep (gate permutation, transposes, padding).
    params = prepare_params(w_ih, w_hh, b_ih, b_hh, fc_w, fc_b)

    out = emotion_rnn_forward(x, *params, num_classes=C)
    out = jax.block_until_ready(out)

    ref = _reference_forward(x, w_ih, w_hh, b_ih, b_hh, fc_w, fc_b)
    assert out.shape == (B, C)
    assert jnp.allclose(out, ref, atol=1e-4, rtol=1e-4), (out, ref)

    print("KERNEL_OK")
</pallas_src>

<mosaic_0001>
module attributes {stable_mosaic.version = 11 : i64} {
  func.func @_lstm_fc_kernel(%arg0: i32, %arg1: memref<64x16xf32, #tpu.memory_space<vmem>>, %arg2: memref<16x128xf32, #tpu.memory_space<vmem>>, %arg3: memref<32x128xf32, #tpu.memory_space<vmem>>, %arg4: memref<1x128xf32, #tpu.memory_space<vmem>>, %arg5: memref<32x128xf32, #tpu.memory_space<vmem>>, %arg6: memref<1x128xf32, #tpu.memory_space<vmem>>, %arg7: memref<8x128xf32, #tpu.memory_space<vmem>>) attributes {dimension_semantics = [#tpu.dimension_semantics<arbitrary>], iteration_bounds = array<i64: 1>, scalar_prefetch = 0 : i64, scratch_operands = 0 : i64, tpu.core_type = #tpu.core_type<tc>, window_params = [{pipeline_mode = #tpu.pipeline_mode<synchronous>, transform_indices = @transform_0, window_bounds = array<i64: 64, 16>}, {pipeline_mode = #tpu.pipeline_mode<synchronous>, transform_indices = @transform_1, window_bounds = array<i64: 16, 128>}, {pipeline_mode = #tpu.pipeline_mode<synchronous>, transform_indices = @transform_2, window_bounds = array<i64: 32, 128>}, {pipeline_mode = #tpu.pipeline_mode<synchronous>, transform_indices = @transform_3, window_bounds = array<i64: 1, 128>}, {pipeline_mode = #tpu.pipeline_mode<synchronous>, transform_indices = @transform_4, window_bounds = array<i64: 32, 128>}, {pipeline_mode = #tpu.pipeline_mode<synchronous>, transform_indices = @transform_5, window_bounds = array<i64: 1, 128>}, {pipeline_mode = #tpu.pipeline_mode<synchronous>, transform_indices = @transform_6, window_bounds = array<i64: 8, 128>}]} {
    %c0 = arith.constant 0 : index
    %c0_0 = arith.constant 0 : index
    %0 = vector.load %arg1[%c0, %c0_0] : memref<64x16xf32, #tpu.memory_space<vmem>>, vector<64x16xf32>
    %c0_1 = arith.constant 0 : index
    %c0_2 = arith.constant 0 : index
    %1 = vector.load %arg2[%c0_1, %c0_2] : memref<16x128xf32, #tpu.memory_space<vmem>>, vector<16x128xf32>
    %cst = arith.constant dense<0.000000e+00> : vector<64x128xf32>
    %2 = tpu.matmul %0, %1, %cst {dimension_numbers = #tpu.dot_dimension_numbers<[1], [0], [0], [1], [0, 0, 1, 1], [], []>} : vector<64x16xf32>, vector<16x128xf32>, vector<64x128xf32> -> vector<64x128xf32>
    %c0_3 = arith.constant 0 : index
    %c0_4 = arith.constant 0 : index
    %3 = vector.load %arg4[%c0_3, %c0_4] : memref<1x128xf32, #tpu.memory_space<vmem>>, vector<1x128xf32>
    %4 = vector.broadcast %3 : vector<1x128xf32> to vector<64x128xf32>
    %5 = arith.addf %2, %4 : vector<64x128xf32>
    %c0_5 = arith.constant 0 : index
    %c0_6 = arith.constant 0 : index
    %6 = vector.load %arg3[%c0_5, %c0_6] : memref<32x128xf32, #tpu.memory_space<vmem>>, vector<32x128xf32>
    %cst_7 = arith.constant 0.000000e+00 : f32
    %7 = vector.broadcast %cst_7 : f32 to vector<8x32xf32>
    %cst_8 = arith.constant 0.000000e+00 : f32
    %8 = vector.broadcast %cst_8 : f32 to vector<8x32xf32>
    %9 = vector.extract_strided_slice %5 {offsets = [0, 0], sizes = [8, 128], strides = [1, 1]} : vector<64x128xf32> to vector<8x128xf32>
    %cst_9 = arith.constant dense<0.000000e+00> : vector<8x128xf32>
    %10 = tpu.matmul %7, %6, %cst_9 {dimension_numbers = #tpu.dot_dimension_numbers<[1], [0], [0], [1], [0, 0, 1, 1], [], []>} : vector<8x32xf32>, vector<32x128xf32>, vector<8x128xf32> -> vector<8x128xf32>
    %11 = arith.addf %9, %10 : vector<8x128xf32>
    %12 = vector.extract_strided_slice %11 {offsets = [0, 0], sizes = [8, 96], strides = [1, 1]} : vector<8x128xf32> to vector<8x96xf32>
    %13 = arith.negf %12 : vector<8x96xf32>
    %14 = math.exp %13 : vector<8x96xf32>
    %cst_10 = arith.constant 1.000000e+00 : f32
    %15 = vector.broadcast %cst_10 : f32 to vector<8x96xf32>
    %16 = arith.addf %15, %14 : vector<8x96xf32>
    %17 = arith.divf %15, %16 : vector<8x96xf32>
    %18 = vector.extract_strided_slice %17 {offsets = [0, 0], sizes = [8, 32], strides = [1, 1]} : vector<8x96xf32> to vector<8x32xf32>
    %19 = vector.extract_strided_slice %17 {offsets = [0, 32], sizes = [8, 32], strides = [1, 1]} : vector<8x96xf32> to vector<8x32xf32>
    %20 = vector.extract_strided_slice %17 {offsets = [0, 64], sizes = [8, 32], strides = [1, 1]} : vector<8x96xf32> to vector<8x32xf32>
    %21 = vector.extract_strided_slice %11 {offsets = [0, 96], sizes = [8, 32], strides = [1, 1]} : vector<8x128xf32> to vector<8x32xf32>
    %22 = math.tanh %21 : vector<8x32xf32>
    %23 = arith.mulf %19, %8 : vector<8x32xf32>
    %24 = arith.mulf %18, %22 : vector<8x32xf32>
    %25 = arith.addf %23, %24 : vector<8x32xf32>
    %26 = math.tanh %25 : vector<8x32xf32>
    %27 = arith.mulf %20, %26 : vector<8x32xf32>
    %28 = vector.extract_strided_slice %5 {offsets = [8, 0], sizes = [8, 128], strides = [1, 1]} : vector<64x128xf32> to vector<8x128xf32>
    %cst_11 = arith.constant dense<0.000000e+00> : vector<8x128xf32>
    %29 = tpu.matmul %27, %6, %cst_11 {dimension_numbers = #tpu.dot_dimension_numbers<[1], [0], [0], [1], [0, 0, 1, 1], [], []>} : vector<8x32xf32>, vector<32x128xf32>, vector<8x128xf32> -> vector<8x128xf32>
    %30 = arith.addf %28, %29 : vector<8x128xf32>
    %31 = vector.extract_strided_slice %30 {offsets = [0, 0], sizes = [8, 96], strides = [1, 1]} : vector<8x128xf32> to vector<8x96xf32>
    %32 = arith.negf %31 : vector<8x96xf32>
    %33 = math.exp %32 : vector<8x96xf32>
    %cst_12 = arith.constant 1.000000e+00 : f32
    %34 = vector.broadcast %cst_12 : f32 to vector<8x96xf32>
    %35 = arith.addf %34, %33 : vector<8x96xf32>
    %36 = arith.divf %34, %35 : vector<8x96xf32>
    %37 = vector.extract_strided_slice %36 {offsets = [0, 0], sizes = [8, 32], strides = [1, 1]} : vector<8x96xf32> to vector<8x32xf32>
    %38 = vector.extract_strided_slice %36 {offsets = [0, 32], sizes = [8, 32], strides = [1, 1]} : vector<8x96xf32> to vector<8x32xf32>
    %39 = vector.extract_strided_slice %36 {offsets = [0, 64], sizes = [8, 32], strides = [1, 1]} : vector<8x96xf32> to vector<8x32xf32>
    %40 = vector.extract_strided_slice %30 {offsets = [0, 96], sizes = [8, 32], strides = [1, 1]} : vector<8x128xf32> to vector<8x32xf32>
    %41 = math.tanh %40 : vector<8x32xf32>
    %42 = arith.mulf %38, %25 : vector<8x32xf32>
    %43 = arith.mulf %37, %41 : vector<8x32xf32>
    %44 = arith.addf %42, %43 : vector<8x32xf32>
    %45 = math.tanh %44 : vector<8x32xf32>
    %46 = arith.mulf %39, %45 : vector<8x32xf32>
    %47 = vector.extract_strided_slice %5 {offsets = [16, 0], sizes = [8, 128], strides = [1, 1]} : vector<64x128xf32> to vector<8x128xf32>
    %cst_13 = arith.constant dense<0.000000e+00> : vector<8x128xf32>
    %48 = tpu.matmul %46, %6, %cst_13 {dimension_numbers = #tpu.dot_dimension_numbers<[1], [0], [0], [1], [0, 0, 1, 1], [], []>} : vector<8x32xf32>, vector<32x128xf32>, vector<8x128xf32> -> vector<8x128xf32>
    %49 = arith.addf %47, %48 : vector<8x128xf32>
    %50 = vector.extract_strided_slice %49 {offsets = [0, 0], sizes = [8, 96], strides = [1, 1]} : vector<8x128xf32> to vector<8x96xf32>
    %51 = arith.negf %50 : vector<8x96xf32>
    %52 = math.exp %51 : vector<8x96xf32>
    %cst_14 = arith.constant 1.000000e+00 : f32
    %53 = vector.broadcast %cst_14 : f32 to vector<8x96xf32>
    %54 = arith.addf %53, %52 : vector<8x96xf32>
    %55 = arith.divf %53, %54 : vector<8x96xf32>
    %56 = vector.extract_strided_slice %55 {offsets = [0, 0], sizes = [8, 32], strides = [1, 1]} : vector<8x96xf32> to vector<8x32xf32>
    %57 = vector.extract_strided_slice %55 {offsets = [0, 32], sizes = [8, 32], strides = [1, 1]} : vector<8x96xf32> to vector<8x32xf32>
    %58 = vector.extract_strided_slice %55 {offsets = [0, 64], sizes = [8, 32], strides = [1, 1]} : vector<8x96xf32> to vector<8x32xf32>
    %59 = vector.extract_strided_slice %49 {offsets = [0, 96], sizes = [8, 32], strides = [1, 1]} : vector<8x128xf32> to vector<8x32xf32>
    %60 = math.tanh %59 : vector<8x32xf32>
    %61 = arith.mulf %57, %44 : vector<8x32xf32>
    %62 = arith.mulf %56, %60 : vector<8x32xf32>
    %63 = arith.addf %61, %62 : vector<8x32xf32>
    %64 = math.tanh %63 : vector<8x32xf32>
    %65 = arith.mulf %58, %64 : vector<8x32xf32>
    %66 = vector.extract_strided_slice %5 {offsets = [24, 0], sizes = [8, 128], strides = [1, 1]} : vector<64x128xf32> to vector<8x128xf32>
    %cst_15 = arith.constant dense<0.000000e+00> : vector<8x128xf32>
    %67 = tpu.matmul %65, %6, %cst_15 {dimension_numbers = #tpu.dot_dimension_numbers<[1], [0], [0], [1], [0, 0, 1, 1], [], []>} : vector<8x32xf32>, vector<32x128xf32>, vector<8x128xf32> -> vector<8x128xf32>
    %68 = arith.addf %66, %67 : vector<8x128xf32>
    %69 = vector.extract_strided_slice %68 {offsets = [0, 0], sizes = [8, 96], strides = [1, 1]} : vector<8x128xf32> to vector<8x96xf32>
    %70 = arith.negf %69 : vector<8x96xf32>
    %71 = math.exp %70 : vector<8x96xf32>
    %cst_16 = arith.constant 1.000000e+00 : f32
    %72 = vector.broadcast %cst_16 : f32 to vector<8x96xf32>
    %73 = arith.addf %72, %71 : vector<8x96xf32>
    %74 = arith.divf %72, %73 : vector<8x96xf32>
    %75 = vector.extract_strided_slice %74 {offsets = [0, 0], sizes = [8, 32], strides = [1, 1]} : vector<8x96xf32> to vector<8x32xf32>
    %76 = vector.extract_strided_slice %74 {offsets = [0, 32], sizes = [8, 32], strides = [1, 1]} : vector<8x96xf32> to vector<8x32xf32>
    %77 = vector.extract_strided_slice %74 {offsets = [0, 64], sizes = [8, 32], strides = [1, 1]} : vector<8x96xf32> to vector<8x32xf32>
    %78 = vector.extract_strided_slice %68 {offsets = [0, 96], sizes = [8, 32], strides = [1, 1]} : vector<8x128xf32> to vector<8x32xf32>
    %79 = math.tanh %78 : vector<8x32xf32>
    %80 = arith.mulf %76, %63 : vector<8x32xf32>
    %81 = arith.mulf %75, %79 : vector<8x32xf32>
    %82 = arith.addf %80, %81 : vector<8x32xf32>
    %83 = math.tanh %82 : vector<8x32xf32>
    %84 = arith.mulf %77, %83 : vector<8x32xf32>
    %85 = vector.extract_strided_slice %5 {offsets = [32, 0], sizes = [8, 128], strides = [1, 1]} : vector<64x128xf32> to vector<8x128xf32>
    %cst_17 = arith.constant dense<0.000000e+00> : vector<8x128xf32>
    %86 = tpu.matmul %84, %6, %cst_17 {dimension_numbers = #tpu.dot_dimension_numbers<[1], [0], [0], [1], [0, 0, 1, 1], [], []>} : vector<8x32xf32>, vector<32x128xf32>, vector<8x128xf32> -> vector<8x128xf32>
    %87 = arith.addf %85, %86 : vector<8x128xf32>
    %88 = vector.extract_strided_slice %87 {offsets = [0, 0], sizes = [8, 96], strides = [1, 1]} : vector<8x128xf32> to vector<8x96xf32>
    %89 = arith.negf %88 : vector<8x96xf32>
    %90 = math.exp %89 : vector<8x96xf32>
    %cst_18 = arith.constant 1.000000e+00 : f32
    %91 = vector.broadcast %cst_18 : f32 to vector<8x96xf32>
    %92 = arith.addf %91, %90 : vector<8x96xf32>
    %93 = arith.divf %91, %92 : vector<8x96xf32>
    %94 = vector.extract_strided_slice %93 {offsets = [0, 0], sizes = [8, 32], strides = [1, 1]} : vector<8x96xf32> to vector<8x32xf32>
    %95 = vector.extract_strided_slice %93 {offsets = [0, 32], sizes = [8, 32], strides = [1, 1]} : vector<8x96xf32> to vector<8x32xf32>
    %96 = vector.extract_strided_slice %93 {offsets = [0, 64], sizes = [8, 32], strides = [1, 1]} : vector<8x96xf32> to vector<8x32xf32>
    %97 = vector.extract_strided_slice %87 {offsets = [0, 96], sizes = [8, 32], strides = [1, 1]} : vector<8x128xf32> to vector<8x32xf32>
    %98 = math.tanh %97 : vector<8x32xf32>
    %99 = arith.mulf %95, %82 : vector<8x32xf32>
    %100 = arith.mulf %94, %98 : vector<8x32xf32>
    %101 = arith.addf %99, %100 : vector<8x32xf32>
    %102 = math.tanh %101 : vector<8x32xf32>
    %103 = arith.mulf %96, %102 : vector<8x32xf32>
    %104 = vector.extract_strided_slice %5 {offsets = [40, 0], sizes = [8, 128], strides = [1, 1]} : vector<64x128xf32> to vector<8x128xf32>
    %cst_19 = arith.constant dense<0.000000e+00> : vector<8x128xf32>
    %105 = tpu.matmul %103, %6, %cst_19 {dimension_numbers = #tpu.dot_dimension_numbers<[1], [0], [0], [1], [0, 0, 1, 1], [], []>} : vector<8x32xf32>, vector<32x128xf32>, vector<8x128xf32> -> vector<8x128xf32>
    %106 = arith.addf %104, %105 : vector<8x128xf32>
    %107 = vector.extract_strided_slice %106 {offsets = [0, 0], sizes = [8, 96], strides = [1, 1]} : vector<8x128xf32> to vector<8x96xf32>
    %108 = arith.negf %107 : vector<8x96xf32>
    %109 = math.exp %108 : vector<8x96xf32>
    %cst_20 = arith.constant 1.000000e+00 : f32
    %110 = vector.broadcast %cst_20 : f32 to vector<8x96xf32>
    %111 = arith.addf %110, %109 : vector<8x96xf32>
    %112 = arith.divf %110, %111 : vector<8x96xf32>
    %113 = vector.extract_strided_slice %112 {offsets = [0, 0], sizes = [8, 32], strides = [1, 1]} : vector<8x96xf32> to vector<8x32xf32>
    %114 = vector.extract_strided_slice %112 {offsets = [0, 32], sizes = [8, 32], strides = [1, 1]} : vector<8x96xf32> to vector<8x32xf32>
    %115 = vector.extract_strided_slice %112 {offsets = [0, 64], sizes = [8, 32], strides = [1, 1]} : vector<8x96xf32> to vector<8x32xf32>
    %116 = vector.extract_strided_slice %106 {offsets = [0, 96], sizes = [8, 32], strides = [1, 1]} : vector<8x128xf32> to vector<8x32xf32>
    %117 = math.tanh %116 : vector<8x32xf32>
    %118 = arith.mulf %114, %101 : vector<8x32xf32>
    %119 = arith.mulf %113, %117 : vector<8x32xf32>
    %120 = arith.addf %118, %119 : vector<8x32xf32>
    %121 = math.tanh %120 : vector<8x32xf32>
    %122 = arith.mulf %115, %121 : vector<8x32xf32>
    %123 = vector.extract_strided_slice %5 {offsets = [48, 0], sizes = [8, 128], strides = [1, 1]} : vector<64x128xf32> to vector<8x128xf32>
    %cst_21 = arith.constant dense<0.000000e+00> : vector<8x128xf32>
    %124 = tpu.matmul %122, %6, %cst_21 {dimension_numbers = #tpu.dot_dimension_numbers<[1], [0], [0], [1], [0, 0, 1, 1], [], []>} : vector<8x32xf32>, vector<32x128xf32>, vector<8x128xf32> -> vector<8x128xf32>
    %125 = arith.addf %123, %124 : vector<8x128xf32>
    %126 = vector.extract_strided_slice %125 {offsets = [0, 0], sizes = [8, 96], strides = [1, 1]} : vector<8x128xf32> to vector<8x96xf32>
    %127 = arith.negf %126 : vector<8x96xf32>
    %128 = math.exp %127 : vector<8x96xf32>
    %cst_22 = arith.constant 1.000000e+00 : f32
    %129 = vector.broadcast %cst_22 : f32 to vector<8x96xf32>
    %130 = arith.addf %129, %128 : vector<8x96xf32>
    %131 = arith.divf %129, %130 : vector<8x96xf32>
    %132 = vector.extract_strided_slice %131 {offsets = [0, 0], sizes = [8, 32], strides = [1, 1]} : vector<8x96xf32> to vector<8x32xf32>
    %133 = vector.extract_strided_slice %131 {offsets = [0, 32], sizes = [8, 32], strides = [1, 1]} : vector<8x96xf32> to vector<8x32xf32>
    %134 = vector.extract_strided_slice %131 {offsets = [0, 64], sizes = [8, 32], strides = [1, 1]} : vector<8x96xf32> to vector<8x32xf32>
    %135 = vector.extract_strided_slice %125 {offsets = [0, 96], sizes = [8, 32], strides = [1, 1]} : vector<8x128xf32> to vector<8x32xf32>
    %136 = math.tanh %135 : vector<8x32xf32>
    %137 = arith.mulf %133, %120 : vector<8x32xf32>
    %138 = arith.mulf %132, %136 : vector<8x32xf32>
    %139 = arith.addf %137, %138 : vector<8x32xf32>
    %140 = math.tanh %139 : vector<8x32xf32>
    %141 = arith.mulf %134, %140 : vector<8x32xf32>
    %142 = vector.extract_strided_slice %5 {offsets = [56, 0], sizes = [8, 128], strides = [1, 1]} : vector<64x128xf32> to vector<8x128xf32>
    %cst_23 = arith.constant dense<0.000000e+00> : vector<8x128xf32>
    %143 = tpu.matmul %141, %6, %cst_23 {dimension_numbers = #tpu.dot_dimension_numbers<[1], [0], [0], [1], [0, 0, 1, 1], [], []>} : vector<8x32xf32>, vector<32x128xf32>, vector<8x128xf32> -> vector<8x128xf32>
    %144 = arith.addf %142, %143 : vector<8x128xf32>
    %145 = vector.extract_strided_slice %144 {offsets = [0, 0], sizes = [8, 96], strides = [1, 1]} : vector<8x128xf32> to vector<8x96xf32>
    %146 = arith.negf %145 : vector<8x96xf32>
    %147 = math.exp %146 : vector<8x96xf32>
    %cst_24 = arith.constant 1.000000e+00 : f32
    %148 = vector.broadcast %cst_24 : f32 to vector<8x96xf32>
    %149 = arith.addf %148, %147 : vector<8x96xf32>
    %150 = arith.divf %148, %149 : vector<8x96xf32>
    %151 = vector.extract_strided_slice %150 {offsets = [0, 0], sizes = [8, 32], strides = [1, 1]} : vector<8x96xf32> to vector<8x32xf32>
    %152 = vector.extract_strided_slice %150 {offsets = [0, 32], sizes = [8, 32], strides = [1, 1]} : vector<8x96xf32> to vector<8x32xf32>
    %153 = vector.extract_strided_slice %150 {offsets = [0, 64], sizes = [8, 32], strides = [1, 1]} : vector<8x96xf32> to vector<8x32xf32>
    %154 = vector.extract_strided_slice %144 {offsets = [0, 96], sizes = [8, 32], strides = [1, 1]} : vector<8x128xf32> to vector<8x32xf32>
    %155 = math.tanh %154 : vector<8x32xf32>
    %156 = arith.mulf %152, %139 : vector<8x32xf32>
    %157 = arith.mulf %151, %155 : vector<8x32xf32>
    %158 = arith.addf %156, %157 : vector<8x32xf32>
    %159 = math.tanh %158 : vector<8x32xf32>
    %160 = arith.mulf %153, %159 : vector<8x32xf32>
    %c0_25 = arith.constant 0 : index
    %c0_26 = arith.constant 0 : index
    %161 = vector.load %arg5[%c0_25, %c0_26] : memref<32x128xf32, #tpu.memory_space<vmem>>, vector<32x128xf32>
    %cst_27 = arith.constant dense<0.000000e+00> : vector<8x128xf32>
    %162 = tpu.matmul %160, %161, %cst_27 {dimension_numbers = #tpu.dot_dimension_numbers<[1], [0], [0], [1], [0, 0, 1, 1], [], []>} : vector<8x32xf32>, vector<32x128xf32>, vector<8x128xf32> -> vector<8x128xf32>
    %c0_28 = arith.constant 0 : index
    %c0_29 = arith.constant 0 : index
    %163 = vector.load %arg6[%c0_28, %c0_29] : memref<1x128xf32, #tpu.memory_space<vmem>>, vector<1x128xf32>
    %164 = vector.broadcast %163 : vector<1x128xf32> to vector<8x128xf32>
    %165 = arith.addf %162, %164 : vector<8x128xf32>
    %c0_30 = arith.constant 0 : index
    %c0_31 = arith.constant 0 : index
    %166 = vector.load %arg7[%c0_30, %c0_31] : memref<8x128xf32, #tpu.memory_space<vmem>>, vector<8x128xf32>
    tpu.vector_store %arg7[%c0_30, %c0_31], %165 {strides = array<i32>} : memref<8x128xf32, #tpu.memory_space<vmem>>, vector<8x128xf32>,
    return
  }
  func.func @transform_0(%arg0: i32) -> (i32, i32) {
    %c0_i32 = arith.constant 0 : i32
    %c0_i32_0 = arith.constant 0 : i32
    %c0_i32_1 = arith.constant 0 : i32
    return %c0_i32, %c0_i32_0 : i32, i32
  }
  func.func @transform_1(%arg0: i32) -> (i32, i32) {
    %c0_i32 = arith.constant 0 : i32
    %c0_i32_0 = arith.constant 0 : i32
    %c0_i32_1 = arith.constant 0 : i32
    return %c0_i32, %c0_i32_0 : i32, i32
  }
  func.func @transform_2(%arg0: i32) -> (i32, i32) {
    %c0_i32 = arith.constant 0 : i32
    %c0_i32_0 = arith.constant 0 : i32
    %c0_i32_1 = arith.constant 0 : i32
    return %c0_i32, %c0_i32_0 : i32, i32
  }
  func.func @transform_3(%arg0: i32) -> (i32, i32) {
    %c0_i32 = arith.constant 0 : i32
    %c0_i32_0 = arith.constant 0 : i32
    %c0_i32_1 = arith.constant 0 : i32
    return %c0_i32, %c0_i32_0 : i32, i32
  }
  func.func @transform_4(%arg0: i32) -> (i32, i32) {
    %c0_i32 = arith.constant 0 : i32
    %c0_i32_0 = arith.constant 0 : i32
    %c0_i32_1 = arith.constant 0 : i32
    return %c0_i32, %c0_i32_0 : i32, i32
  }
  func.func @transform_5(%arg0: i32) -> (i32, i32) {
    %c0_i32 = arith.constant 0 : i32
    %c0_i32_0 = arith.constant 0 : i32
    %c0_i32_1 = arith.constant 0 : i32
    return %c0_i32, %c0_i32_0 : i32, i32
  }
  func.func @transform_6(%arg0: i32) -> (i32, i32) {
    %c0_i32 = arith.constant 0 : i32
    %c0_i32_0 = arith.constant 0 : i32
    %c0_i32_1 = arith.constant 0 : i32
    return %c0_i32, %c0_i32_0 : i32, i32
  }
}

</mosaic_0001>

<bundles_post_ra>
// kernel: emotion_rnn_forward.1
= control target key start
LH: loop header
LB: loop body
LE: loop exit
PB: predicated region body
PF: predicated region fallthrough
CT: control target
= control target key end

     0   :  { %vm40_vm0 = vcmask 130048   ;;  %v1387_v0 = vmov 0.0|0.0   ;;  %vm1388_vm1 = vmmov 0   ;;  %v1389_v4 = vmov 0.0   ;;  %s1390_s13 = smov 32   ;;  %s1617_s1 = inlined_call_operand.vmem [shape: f32[16,128], index: 1, kind: input, shape index: {}]   ;;  %s1618_s2 = inlined_call_operand.vmem [shape: f32[32,128], index: 2, kind: input, shape index: {}]   ;;  %s1619_s0 = inlined_call_operand.vmem [shape: f32[64,16], index: 0, kind: input, shape index: {}]   ;;  %s1620_s3 = inlined_call_operand.vmem [shape: f32[1,128], index: 3, kind: input, shape index: {}]   ;;  %s1621_s4 = inlined_call_operand.vmem [shape: f32[32,128], index: 4, kind: input, shape index: {}]   ;;  %s1622_s5 = inlined_call_operand.vmem [shape: f32[1,128], index: 5, kind: input, shape index: {}]   ;;  %s1623_s6 = inlined_call_operand.vmem [shape: f32[8,128], index: 6, kind: output, shape index: {}]  }
   0x1   :  { %1264 = vmatprep.subr.bf16.mxu1 %v1387_v0  ;;  %v31_v1 = vld [vmem:[%s1617_s1] sm:$0xff]  ;;  %v32_v2 = vld [vmem:[%s1617_s1 + $0x8] sm:$0xff]  ;;  %1169 = vmatprep.mubr.msk.f32.mxu1 %vm1388_vm1, %v1389_v4  ;;  %v172_v9 = vld [vmem:[%s1618_s2 + $0x10] sm:$0xff]  ;;  %vm174_vm2 = vcmask 261120  }
   0x2   :  { %v170_v3 = vld [vmem:[%s1618_s2] sm:$0xff]  ;;  %v1260_v5 = vpack.c.bf16 %v32_v2, %v31_v1  ;;  %v171_v6 = vld [vmem:[%s1618_s2 + $0x8] sm:$0xff]  ;;  %v173_v10 = vld [vmem:[%s1618_s2 + $0x18] sm:$0xff] }
   0x3   :  { %v23_v7 = vld [vmem:[%s1619_s0] sm:$0xff]  ;;  %v1445_v8 = vpack.c.bf16 %v171_v6, %v170_v3  ;;  %v24_v11 = vld [vmem:[%s1619_s0 + $0x8] sm:$0xff]  ;;  %v1458_v12 = vpack.c.bf16 %v173_v10, %v172_v9  ;;  %v25_v48 = vld [vmem:[%s1619_s0 + $0x10] sm:$0xff] }
   0x4   :  { %1149 = vmatprep.mubr.msk.f32.mxu0 %vm40_vm0, %v23_v7  ;;  %1261 = vmatprep.subr.bf16.mxu0 %v1260_v5  ;;  %v1479_v13 = vld [vmem:[%s1620_s3] ss:$0 sm:$0xff]  ;;  %s1391_s3 = smov 64   ;;  %v26_v49 = vld [vmem:[%s1619_s0 + $0x18] sm:$0xff]  ;;  %v28_v51 = vld [vmem:[%s1619_s0 + $0x28] sm:$0xff] }
   0x5   :  { %1266 = vmatpush3.bf16.msra.mxu1 %v1445_v8  ;;  %1263 = vmatpush3.bf16.msra.mxu0 %v1260_v5  ;;  %v27_v50 = vld [vmem:[%s1619_s0 + $0x20] sm:$0xff]  ;;  %v29_v52 = vld [vmem:[%s1619_s0 + $0x30] sm:$0xff]  ;;  %v30_v53 = vld [vmem:[%s1619_s0 + $0x38] sm:$0xff] }
   0x6   :  { %1267 = vmatprep.subr.bf16.mxu1 %v1387_v0  ;;  %1276 = vmatprep.subr.bf16.mxu0 %v1387_v0 }
   0x8   :  { %1150 = vmatmul.mubr.msk.f32.vlgmr.msra.gmra.mrb[0].mxu0 %vm40_vm0, %v24_v11 }
   0x9   :  { %1269 = vmatpush3.bf16.msra.mxu1 %v1458_v12  ;;  %1278 = vmatpush3.bf16.msra.mxu0 %v1445_v8 }
   0xa   :  { %1270 = vmatprep.subr.bf16.mxu1 %v1387_v0  ;;  %1279 = vmatprep.subr.bf16.mxu0 %v1387_v0 }
   0xb   :  { %1152 = vmatprep.mubr.msk.f32.mxu0 %vm40_vm0, %v25_v48 }
   0xc   :  { %1170 = vmatmul.mubr.f32.vlgmr.msra.gmra.mrb[0].mxu1 %v1389_v4  ;;  %1153 = vmatmul.mubr.msk.f32.gmra.mrb[2].mxu0 %vm40_vm0, %v26_v49 }
   0xd   :  { %1272 = vmatpush3.bf16.msra.mxu1 %v1445_v8  ;;  %1180 = vmatprep.mubr.msk.f32.mxu1 %vm1388_vm1, %v1389_v4 }
   0xe   :  { %1273 = vmatprep.subr.bf16.mxu1 %v1387_v0  ;;  %1281 = vmatpush3.bf16.msra.mxu0 %v1458_v12 }
   0xf   :  { %1288 = vmatprep.subr.bf16.mxu0 %v1387_v0  ;;  %1155 = vmatprep.mubr.msk.f32.mxu0 %vm40_vm0, %v27_v50 }
  0x10   :  { %1156 = vmatmul.mubr.msk.f32.gmra.mrb[4].mxu0 %vm40_vm0, %v28_v51 }
  0x11   :  { %1275 = vmatpush3.bf16.msra.mxu1 %v1458_v12  ;;  %1158 = vmatprep.mubr.msk.f32.mxu0 %vm40_vm0, %v29_v52 }
  0x12   :  { %1282 = vmatprep.subr.bf16.mxu1 %v1387_v0 }
  0x14   :  { %1159 = vmatmul.mubr.msk.f32.gmra.mrb[6].mxu0 %vm40_vm0, %v30_v53 }
  0x15   :  { %1191 = vmatprep.mubr.msk.f32.mxu0 %vm1388_vm1, %v1389_v4 }
  0xdb   :  { %v1151_v14 = vpop.f32.mrb[0].mxu0 }
  0xdc   :  { %v131_v15 = vpop.f32.mrb[1].mxu0  ;;  %v137_v34 = vadd.f32 %v1151_v14, %v1479_v13 }
  0xdd   :  { %v132_v16 = vadd.f32 %v1479_v13, %v131_v15 }
  0xdf   :  { %v244_v17 = vpop.f32.mrb[0].mxu1  ;;  %v1154_v57 = vpop.f32.mrb[2].mxu0 }
  0xe0   :  { %v248_v18 = vadd.f32 %v244_v17, %v132_v16  ;;  %v1171_v19 = vpop.f32.mrb[1].mxu1  ;;  %v141_v58 = vpop.f32.mrb[3].mxu0 }
  0xe1   :  { %v142_v1 = vadd.f32 %v1479_v13, %v141_v58 }
  0xe2   :  { %1323 = vtanh.f32 %v248_v18  ;;  %v1073_v21 = vmul.f32 -1.442695, %v248_v18 }
  0xe3   :  { %v1524_v59 = vpop.f32.mrb[4].mxu0 }
  0xe4   :  { %1325 = vpow2.f32 %v1073_v21  ;;  %v1526_v60 = vpop.f32.mrb[5].mxu0 }
  0xe7   :  { %v1528_v61 = vpop.f32.mrb[6].mxu0 }
  0xe8   :  { %v1530_v62 = vpop.f32.mrb[7].mxu0 }
  0xec   :  { %v1324_v20 = vpop.eup %1323 }
  0xed   :  { %258 = vrot.lane.b32.xlu0 %v1324_v20, %s1390_s13 }
  0xee   :  { %v1326_v22 = vpop.eup %1325 }
  0xef   :  { %v252_v23 = vadd.f32 1.0, %v1326_v22 }
  0xf1   :  { %1327 = vrcp.f32 %v252_v23  ;;  %v147_v23 = vadd.f32 %v1154_v57, %v1479_v13 }
  0xfb   :  { %v1328_v24 = vpop.eup %1327 }
  0xfc   :  { %v256_v27 = vmul.f32 0.0, %v1328_v24 }
 0x15f   :  { %v259_v25 = vpop.permute.xlu0 %258 }
 0x160   :  { %v261_v26 = vmul.f32 %v1328_v24, %v259_v25 }
 0x162   :  { %263 = vrot.lane.b32.xlu0 %v261_v26, %s1390_s13 }
 0x1d4   :  { %v264_v28 = vpop.permute.xlu0 %263 }
 0x1d5   :  { %v266_v29 = vadd.f32 %v264_v28, %v256_v27 }
 0x1d7   :  { %1329 = vtanh.f32 %v266_v29 }
 0x1e1   :  { %v1330_v30 = vpop.eup %1329 }
 0x1e2   :  { %269 = vrot.lane.b32.xlu1 %v1330_v30, %s1390_s13 }
 0x254   :  { %v270_v31 = vpop.permute.xlu1 %269 }
 0x255   :  { %v272_v32 = vmul.f32 %v1328_v24, %v270_v31 }
 0x257   :  { %274 = vrot.lane.b32.xlu1 %v272_v32, %s1391_s3 }
 0x2c9   :  { %v275_v33 = vpop.permute.xlu1 %274 }
 0x2ca   :  { %1181 = vmatmul.mubr.msk.f32.vlgmr.msra.gmra.mrb[2].mxu1 %vm174_vm2, %v275_v33 }
 0x2cb   :  { %1284 = vmatpush3.bf16.msra.mxu1 %v1445_v8  ;;  %1202 = vmatprep.mubr.msk.f32.mxu1 %vm1388_vm1, %v1389_v4 }
 0x2cc   :  { %1285 = vmatprep.subr.bf16.mxu1 %v1387_v0 }
 0x2cf   :  { %1287 = vmatpush3.bf16.msra.mxu1 %v1458_v12 }
 0x2d0   :  { %1294 = vmatprep.subr.bf16.mxu1 %v1387_v0 }
 0x39d   :  { %v344_v35 = vpop.f32.mrb[2].mxu1 }
 0x39e   :  { %v348_v36 = vadd.f32 %v344_v35, %v137_v34  ;;  %v1182_v37 = vpop.f32.mrb[3].mxu1 }
 0x3a0   :  { %1331 = vtanh.f32 %v348_v36  ;;  %v1075_v39 = vmul.f32 -1.442695, %v348_v36 }
 0x3a2   :  { %1333 = vpow2.f32 %v1075_v39 }
 0x3aa   :  { %v1332_v38 = vpop.eup %1331 }
 0x3ab   :  { %358 = vrot.lane.b32.xlu0 %v1332_v38, %s1390_s13 }
 0x3ac   :  { %v1334_v40 = vpop.eup %1333 }
 0x3ad   :  { %v352_v41 = vadd.f32 1.0, %v1334_v40 }
 0x3af   :  { %1335 = vrcp.f32 %v352_v41  ;;  %v152_v41 = vadd.f32 %v1479_v13, %v1526_v60  ;;  %v157_v60 = vadd.f32 %v1524_v59, %v1479_v13 }
 0x3b9   :  { %v1336_v42 = vpop.eup %1335 }
 0x3ba   :  { %v356_v45 = vmul.f32 %v1336_v42, %v266_v29 }
 0x41d   :  { %v359_v43 = vpop.permute.xlu0 %358 }
 0x41e   :  { %v361_v44 = vmul.f32 %v1336_v42, %v359_v43 }
 0x420   :  { %363 = vrot.lane.b32.xlu1 %v361_v44, %s1390_s13 }
 0x492   :  { %v364_v46 = vpop.permute.xlu1 %363 }
 0x493   :  { %v366_v47 = vadd.f32 %v364_v46, %v356_v45 }
 0x495   :  { %1337 = vtanh.f32 %v366_v47 }
 0x49f   :  { %v1338_v54 = vpop.eup %1337 }
 0x4a0   :  { %369 = vrot.lane.b32.xlu0 %v1338_v54, %s1390_s13 }
 0x512   :  { %v370_v55 = vpop.permute.xlu0 %369 }
 0x513   :  { %v372_v56 = vmul.f32 %v1336_v42, %v370_v55 }
 0x515   :  { %374 = vrot.lane.b32.xlu1 %v372_v56, %s1391_s3 }
 0x587   :  { %v375_v63 = vpop.permute.xlu1 %374 }
 0x588   :  { %1192 = vmatmul.mubr.msk.f32.vlgmr.msra.gmra.mrb[8].mxu0 %vm174_vm2, %v375_v63 }
 0x589   :  { %1290 = vmatpush3.bf16.msra.mxu0 %v1445_v8  ;;  %1213 = vmatprep.mubr.msk.f32.mxu0 %vm1388_vm1, %v1389_v4 }
 0x58a   :  { %1291 = vmatprep.subr.bf16.mxu0 %v1387_v0 }
 0x58d   :  { %1293 = vmatpush3.bf16.msra.mxu0 %v1458_v12 }
 0x58e   :  { %1300 = vmatprep.subr.bf16.mxu0 %v1387_v0 }
 0x65b   :  { %v444_v2 = vpop.f32.mrb[8].mxu0 }
 0x65c   :  { %v448_v3 = vadd.f32 %v444_v2, %v142_v1  ;;  %v1193_v5 = vpop.f32.mrb[9].mxu0 }
 0x65e   :  { %1339 = vtanh.f32 %v448_v3  ;;  %v1077_v7 = vmul.f32 -1.442695, %v448_v3 }
 0x660   :  { %1341 = vpow2.f32 %v1077_v7 }
 0x668   :  { %v1340_v6 = vpop.eup %1339 }
 0x669   :  { %458 = vrot.lane.b32.xlu0 %v1340_v6, %s1390_s13 }
 0x66a   :  { %v1342_v9 = vpop.eup %1341 }
 0x66b   :  { %v452_v10 = vadd.f32 1.0, %v1342_v9 }
 0x66d   :  { %1343 = vrcp.f32 %v452_v10 }
 0x677   :  { %v1344_v11 = vpop.eup %1343 }
 0x678   :  { %v456_v16 = vmul.f32 %v1344_v11, %v366_v47 }
 0x6db   :  { %v459_v14 = vpop.permute.xlu0 %458 }
 0x6dc   :  { %v461_v15 = vmul.f32 %v1344_v11, %v459_v14 }
 0x6de   :  { %463 = vrot.lane.b32.xlu1 %v461_v15, %s1390_s13 }
 0x750   :  { %v464_v17 = vpop.permute.xlu1 %463 }
 0x751   :  { %v466_v18 = vadd.f32 %v464_v17, %v456_v16 }
 0x753   :  { %1345 = vtanh.f32 %v466_v18 }
 0x75d   :  { %v1346_v19 = vpop.eup %1345 }
 0x75e   :  { %469 = vrot.lane.b32.xlu0 %v1346_v19, %s1390_s13 }
 0x7d0   :  { %v470_v20 = vpop.permute.xlu0 %469 }
 0x7d1   :  { %v472_v21 = vmul.f32 %v1344_v11, %v470_v20 }
 0x7d3   :  { %474 = vrot.lane.b32.xlu1 %v472_v21, %s1391_s3 }
 0x845   :  { %v475_v22 = vpop.permute.xlu1 %474 }
 0x846   :  { %1203 = vmatmul.mubr.msk.f32.vlgmr.msra.gmra.mrb[4].mxu1 %vm174_vm2, %v475_v22 }
 0x847   :  { %1296 = vmatpush3.bf16.msra.mxu1 %v1445_v8  ;;  %1224 = vmatprep.mubr.msk.f32.mxu1 %vm1388_vm1, %v1389_v4 }
 0x848   :  { %1297 = vmatprep.subr.bf16.mxu1 %v1387_v0 }
 0x84b   :  { %1299 = vmatpush3.bf16.msra.mxu1 %v1458_v12 }
 0x84c   :  { %1306 = vmatprep.subr.bf16.mxu1 %v1387_v0 }
 0x919   :  { %v544_v24 = vpop.f32.mrb[4].mxu1 }
 0x91a   :  { %v548_v25 = vadd.f32 %v544_v24, %v147_v23  ;;  %v1204_v26 = vpop.f32.mrb[5].mxu1 }
 0x91c   :  { %1347 = vtanh.f32 %v548_v25  ;;  %v1079_v28 = vmul.f32 -1.442695, %v548_v25 }
 0x91e   :  { %1349 = vpow2.f32 %v1079_v28 }
 0x926   :  { %v1348_v27 = vpop.eup %1347 }
 0x927   :  { %558 = vrot.lane.b32.xlu0 %v1348_v27, %s1390_s13 }
 0x928   :  { %v1350_v29 = vpop.eup %1349 }
 0x929   :  { %v552_v30 = vadd.f32 1.0, %v1350_v29 }
 0x92b   :  { %1351 = vrcp.f32 %v552_v30 }
 0x935   :  { %v1352_v31 = vpop.eup %1351 }
 0x936   :  { %v556_v34 = vmul.f32 %v1352_v31, %v466_v18  ;;  %v162_v18 = vadd.f32 %v1479_v13, %v1530_v62 }
 0x999   :  { %v559_v32 = vpop.permute.xlu0 %558 }
 0x99a   :  { %v561_v33 = vmul.f32 %v1352_v31, %v559_v32 }
 0x99c   :  { %563 = vrot.lane.b32.xlu1 %v561_v33, %s1390_s13 }
 0xa0e   :  { %v564_v35 = vpop.permute.xlu1 %563 }
 0xa0f   :  { %v566_v36 = vadd.f32 %v564_v35, %v556_v34  ;;  %v167_v34 = vadd.f32 %v1528_v61, %v1479_v13  ;;  %v973_v61 = vld [vmem:[%s1621_s4] sm:$0xff] }
 0xa11   :  { %1353 = vtanh.f32 %v566_v36 }
 0xa1b   :  { %v1354_v37 = vpop.eup %1353 }
 0xa1c   :  { %569 = vrot.lane.b32.xlu0 %v1354_v37, %s1390_s13 }
 0xa8e   :  { %v570_v38 = vpop.permute.xlu0 %569 }
 0xa8f   :  { %v572_v39 = vmul.f32 %v1352_v31, %v570_v38 }
 0xa91   :  { %574 = vrot.lane.b32.xlu1 %v572_v39, %s1391_s3 }
 0xb03   :  { %v575_v40 = vpop.permute.xlu1 %574 }
 0xb04   :  { %1214 = vmatmul.mubr.msk.f32.vlgmr.msra.gmra.mrb[10].mxu0 %vm174_vm2, %v575_v40 }
 0xb05   :  { %1302 = vmatpush3.bf16.msra.mxu0 %v1445_v8  ;;  %1235 = vmatprep.mubr.msk.f32.mxu0 %vm1388_vm1, %v1389_v4 }
 0xb06   :  { %1303 = vmatprep.subr.bf16.mxu0 %v1387_v0 }
 0xb09   :  { %1305 = vmatpush3.bf16.msra.mxu0 %v1458_v12 }
 0xb0a   :  { %1312 = vmatprep.subr.bf16.mxu0 %v1387_v0 }
 0xbd7   :  { %v644_v42 = vpop.f32.mrb[10].mxu0 }
 0xbd8   :  { %v648_v43 = vadd.f32 %v644_v42, %v152_v41  ;;  %v1215_v44 = vpop.f32.mrb[11].mxu0 }
 0xbda   :  { %1355 = vtanh.f32 %v648_v43  ;;  %v1081_v46 = vmul.f32 -1.442695, %v648_v43 }
 0xbdc   :  { %1357 = vpow2.f32 %v1081_v46 }
 0xbe4   :  { %v1356_v45 = vpop.eup %1355 }
 0xbe5   :  { %658 = vrot.lane.b32.xlu0 %v1356_v45, %s1390_s13 }
 0xbe6   :  { %v1358_v47 = vpop.eup %1357 }
 0xbe7   :  { %v652_v48 = vadd.f32 1.0, %v1358_v47  ;;  %v974_v47 = vld [vmem:[%s1621_s4 + $0x8] sm:$0xff] }
 0xbe9   :  { %1359 = vrcp.f32 %v652_v48  ;;  %v975_v48 = vld [vmem:[%s1621_s4 + $0x10] sm:$0xff] }
 0xbf3   :  { %v1360_v49 = vpop.eup %1359 }
 0xbf4   :  { %v656_v52 = vmul.f32 %v1360_v49, %v566_v36 }
 0xc57   :  { %v659_v50 = vpop.permute.xlu0 %658 }
 0xc58   :  { %v661_v51 = vmul.f32 %v1360_v49, %v659_v50  ;;  %v976_v50 = vld [vmem:[%s1621_s4 + $0x18] sm:$0xff] }
 0xc5a   :  { %663 = vrot.lane.b32.xlu1 %v661_v51, %s1390_s13  ;;  %v1316_v51 = vpack.c.bf16 %v976_v50, %v975_v48 }
 0xccc   :  { %v664_v53 = vpop.permute.xlu1 %663 }
 0xccd   :  { %v666_v54 = vadd.f32 %v664_v53, %v656_v52 }
 0xccf   :  { %1361 = vtanh.f32 %v666_v54 }
 0xcd9   :  { %v1362_v55 = vpop.eup %1361 }
 0xcda   :  { %669 = vrot.lane.b32.xlu0 %v1362_v55, %s1390_s13 }
 0xd4c   :  { %v670_v56 = vpop.permute.xlu0 %669 }
 0xd4d   :  { %v672_v57 = vmul.f32 %v1360_v49, %v670_v56  ;;  %v1313_v49 = vpack.c.bf16 %v974_v47, %v973_v61  ;;  %v1088_v56 = vld [vmem:[%s1622_s5] ss:$0 sm:$0xff] }
 0xd4f   :  { %674 = vrot.lane.b32.xlu1 %v672_v57, %s1391_s3 }
 0xdc1   :  { %v675_v58 = vpop.permute.xlu1 %674 }
 0xdc2   :  { %1225 = vmatmul.mubr.msk.f32.vlgmr.msra.gmra.mrb[6].mxu1 %vm174_vm2, %v675_v58 }
 0xdc3   :  { %1308 = vmatpush3.bf16.msra.mxu1 %v1445_v8  ;;  %1246 = vmatprep.mubr.msk.f32.mxu1 %vm1388_vm1, %v1389_v4 }
 0xdc4   :  { %1309 = vmatprep.subr.bf16.mxu1 %v1387_v0 }
 0xdc7   :  { %1311 = vmatpush3.bf16.msra.mxu1 %v1458_v12 }
 0xe95   :  { %v744_v63 = vpop.f32.mrb[6].mxu1 }
 0xe96   :  { %v748_v1 = vadd.f32 %v744_v63, %v157_v60  ;;  %v1226_v2 = vpop.f32.mrb[7].mxu1 }
 0xe98   :  { %1363 = vtanh.f32 %v748_v1  ;;  %v1083_v5 = vmul.f32 -1.442695, %v748_v1 }
 0xe9a   :  { %1365 = vpow2.f32 %v1083_v5 }
 0xea2   :  { %v1364_v3 = vpop.eup %1363 }
 0xea3   :  { %758 = vrot.lane.b32.xlu0 %v1364_v3, %s1390_s13 }
 0xea4   :  { %v1366_v8 = vpop.eup %1365 }
 0xea5   :  { %v752_v6 = vadd.f32 1.0, %v1366_v8 }
 0xea7   :  { %1367 = vrcp.f32 %v752_v6 }
 0xeb1   :  { %v1368_v7 = vpop.eup %1367 }
 0xeb2   :  { %v756_v12 = vmul.f32 %v1368_v7, %v666_v54 }
 0xf15   :  { %v759_v9 = vpop.permute.xlu0 %758 }
 0xf16   :  { %v761_v10 = vmul.f32 %v1368_v7, %v759_v9 }
 0xf18   :  { %763 = vrot.lane.b32.xlu1 %v761_v10, %s1390_s13 }
 0xf8a   :  { %v764_v11 = vpop.permute.xlu1 %763 }
 0xf8b   :  { %v766_v59 = vadd.f32 %v764_v11, %v756_v12 }
 0xf8d   :  { %1369 = vtanh.f32 %v766_v59 }
 0xf97   :  { %v1370_v14 = vpop.eup %1369 }
 0xf98   :  { %769 = vrot.lane.b32.xlu0 %v1370_v14, %s1390_s13 }
0x100a   :  { %v770_v15 = vpop.permute.xlu0 %769 }
0x100b   :  { %v772_v16 = vmul.f32 %v1368_v7, %v770_v15 }
0x100d   :  { %774 = vrot.lane.b32.xlu1 %v772_v16, %s1391_s3 }
0x107f   :  { %v775_v17 = vpop.permute.xlu1 %774 }
0x1080   :  { %1236 = vmatmul.mubr.msk.f32.vlgmr.msra.gmra.mrb[12].mxu0 %vm174_vm2, %v775_v17 }
0x1081   :  { %1257 = vmatprep.mubr.msk.f32.mxu0 %vm1388_vm1, %v1389_v4  ;;  %1314 = vmatpush3.bf16.msra.mxu0 %v1313_v49 }
0x1082   :  { %1315 = vmatprep.subr.bf16.mxu0 %v1387_v0 }
0x1085   :  { %1317 = vmatpush3.bf16.msra.mxu0 %v1316_v51 }
0x1153   :  { %v844_v19 = vpop.f32.mrb[12].mxu0 }
0x1154   :  { %v848_v20 = vadd.f32 %v844_v19, %v162_v18  ;;  %v1237_v21 = vpop.f32.mrb[13].mxu0 }
0x1156   :  { %1371 = vtanh.f32 %v848_v20  ;;  %v1085_v23 = vmul.f32 -1.442695, %v848_v20 }
0x1158   :  { %1373 = vpow2.f32 %v1085_v23 }
0x1160   :  { %v1372_v22 = vpop.eup %1371 }
0x1161   :  { %858 = vrot.lane.b32.xlu0 %v1372_v22, %s1390_s13 }
0x1162   :  { %v1374_v24 = vpop.eup %1373 }
0x1163   :  { %v852_v25 = vadd.f32 1.0, %v1374_v24 }
0x1165   :  { %1375 = vrcp.f32 %v852_v25 }
0x116f   :  { %v1376_v26 = vpop.eup %1375 }
0x1170   :  { %v856_v4 = vmul.f32 %v1376_v26, %v766_v59 }
0x11d3   :  { %v859_v27 = vpop.permute.xlu0 %858 }
0x11d4   :  { %v861_v28 = vmul.f32 %v1376_v26, %v859_v27 }
0x11d6   :  { %863 = vrot.lane.b32.xlu1 %v861_v28, %s1390_s13 }
0x1248   :  { %v864_v29 = vpop.permute.xlu1 %863 }
0x1249   :  { %v866_v62 = vadd.f32 %v864_v29, %v856_v4 }
0x124b   :  { %1377 = vtanh.f32 %v866_v62 }
0x1255   :  { %v1378_v30 = vpop.eup %1377 }
0x1256   :  { %869 = vrot.lane.b32.xlu0 %v1378_v30, %s1390_s13 }
0x12c8   :  { %v870_v31 = vpop.permute.xlu0 %869 }
0x12c9   :  { %v872_v32 = vmul.f32 %v1376_v26, %v870_v31 }
0x12cb   :  { %874 = vrot.lane.b32.xlu1 %v872_v32, %s1391_s3 }
0x133d   :  { %v875_v33 = vpop.permute.xlu1 %874 }
0x133e   :  { %1247 = vmatmul.mubr.msk.f32.vlgmr.msra.gmra.mrb[8].mxu1 %vm174_vm2, %v875_v33 }
0x1411   :  { %v944_v35 = vpop.f32.mrb[8].mxu1 }
0x1412   :  { %v948_v36 = vadd.f32 %v944_v35, %v167_v34  ;;  %v1248_v37 = vpop.f32.mrb[9].mxu1 }
0x1414   :  { %1379 = vtanh.f32 %v948_v36  ;;  %v1087_v39 = vmul.f32 -1.442695, %v948_v36 }
0x1416   :  { %1381 = vpow2.f32 %v1087_v39 }
0x141e   :  { %v1380_v38 = vpop.eup %1379 }
0x141f   :  { %958 = vrot.lane.b32.xlu0 %v1380_v38, %s1390_s13 }
0x1420   :  { %v1382_v40 = vpop.eup %1381 }
0x1421   :  { %v952_v41 = vadd.f32 1.0, %v1382_v40 }
0x1423   :  { %1383 = vrcp.f32 %v952_v41 }
0x142d   :  { %v1384_v42 = vpop.eup %1383 }
0x142e   :  { %v956_v45 = vmul.f32 %v1384_v42, %v866_v62 }
0x1491   :  { %v959_v43 = vpop.permute.xlu0 %958 }
0x1492   :  { %v961_v44 = vmul.f32 %v1384_v42, %v959_v43 }
0x1494   :  { %963 = vrot.lane.b32.xlu1 %v961_v44, %s1390_s13 }
0x1506   :  { %v964_v46 = vpop.permute.xlu1 %963 }
0x1507   :  { %v966_v13 = vadd.f32 %v964_v46, %v956_v45 }
0x1509   :  { %1385 = vtanh.f32 %v966_v13 }
0x1513   :  { %v1386_v52 = vpop.eup %1385 }
0x1514   :  { %969 = vrot.lane.b32.xlu0 %v1386_v52, %s1390_s13 }
0x1586   :  { %v970_v53 = vpop.permute.xlu0 %969 }
0x1587   :  { %v972_v54 = vmul.f32 %v1384_v42, %v970_v53 }
0x1589   :  { %985 = vrot.lane.b32.xlu1 %v972_v54, %s1391_s3 }
0x15fb   :  { %v986_v55 = vpop.permute.xlu1 %985 }
0x15fc   :  { %1258 = vmatmul.mubr.msk.f32.vlgmr.msra.gmra.mrb[14].mxu0 %vm174_vm2, %v986_v55 }
0x16cf   :  { %v1055_v57 = vpop.f32.mrb[14].mxu0 }
0x16d0   :  { %v1056_v58 = vadd.f32 %v1088_v56, %v1055_v57  ;;  %v1259_v60 = vpop.f32.mrb[15].mxu0 }
0x16d2   :  { %1059 = vst [vmem:[%s1623_s6] sm:$0xff] %v1056_v58 }

</bundles_post_ra>
